<compile_context>
chip_gen: v5e
topology: v5e:2x2
jax: 0.10.0
libtpu: 0.0.40
codegen_flags: <defaults>
</compile_context>

<pallas_src>
import functools
import math

import jax
import jax.numpy as jnp
from jax.experimental import pallas as pl
from jax.experimental.pallas import tpu as pltpu

# Deterministic, in-script quantile list (the module's ctor indexes into it).
QUANTILES = [0.1, 0.5, 0.9]

_LANES = 128                       # lane-dense last dim
_MAX_TILE_ROWS = 8192              # 8192 x 128 x 4B = 4 MiB per f32 input block
_MEGACORE_SPLIT_ROWS = 4096        # force an even >=2-way grid above this (v7x: 2 TCs)
_VMEM_LIMIT_BYTES = 32 * 1024 * 1024


def _round_up(x, m):
    return ((x + m - 1) // m) * m


def _quantile_loss_kernel(out_ref, tgt_ref, psum_ref, *, q, tm, valid_rows,
                          need_mask):
    o = out_ref[...].astype(jnp.float32)
    t = tgt_ref[...].astype(jnp.float32)
    e = t - o
    if need_mask:
        # Last grid block is ragged: rows >= valid_rows hold unspecified data
        # (possibly stale / non-finite). Zero e itself before mul/max so
        # nothing propagates into the sum.
        row = (jax.lax.broadcasted_iota(jnp.int32, e.shape, 0)
               + pl.program_id(0) * tm)
        e = jnp.where(row < valid_rows, e, 0.0)
    # pinball loss: max(q*e, (q-1)*e)  -- 2 muls + 1 max, constants folded.
    per_elem = jnp.maximum(q * e, (q - 1.0) * e)
    # Fold rows (sublanes) into a single lane-dense (1, 128) partial sum.
    psum_ref[...] = jnp.sum(per_elem, axis=0, keepdims=True)


def _choose_tiling(rows, align):
    """Balanced row tiling: (tile_rows, grid_m)."""
    grid_m = pl.cdiv(rows, _MAX_TILE_ROWS)
    if rows >= _MEGACORE_SPLIT_ROWS:
        # v7x has two TensorCores; make the "parallel" grid split evenly.
        grid_m = max(grid_m, 2)
        if grid_m % 2:
            grid_m += 1
    tm = _round_up(pl.cdiv(rows, grid_m), align)
    if tm >= rows:
        # Single full-extent block (any row count is legal when the block dim
        # equals the full array dim); no raggedness, no mask needed.
        return rows, 1
    grid_m = pl.cdiv(rows, tm)
    return tm, grid_m


def _quantile_loss_impl(outputs, targets, *, q):
    assert outputs.shape == targets.shape
    total = int(math.prod(outputs.shape))
    assert total > 0

    o = outputs.reshape(-1)
    t = targets.reshape(-1)

    rem = total % _LANES
    if rem:
        # TODO(synk): this <=127-element zero pad still makes XLA materialize a
        # padded copy of both inputs; a fully copy-free ragged-lane path would
        # need 1-D blocks + in-kernel lane masking. Zero pad on BOTH tensors
        # => e = 0 => contributes exactly 0 to the sum.
        pad = _LANES - rem
        o = jnp.concatenate([o, jnp.zeros((pad,), o.dtype)])
        t = jnp.concatenate([t, jnp.zeros((pad,), t.dtype)])
    rows = (total + _LANES - 1) // _LANES
    o = o.reshape(rows, _LANES)           # copy-free when rem == 0
    t = t.reshape(rows, _LANES)

    itemsize = jnp.dtype(outputs.dtype).itemsize
    align = max(8, 32 // itemsize)        # 8 for f32, 16 for bf16, 32 for int8/fp8
    tm, grid_m = _choose_tiling(rows, align)
    need_mask = (grid_m * tm != rows)     # ragged last block -> mask in-kernel

    kernel = functools.partial(
        _quantile_loss_kernel, q=q, tm=tm, valid_rows=rows, need_mask=need_mask)

    psums = pl.pallas_call(
        kernel,
        out_shape=jax.ShapeDtypeStruct((grid_m, _LANES), jnp.float32),
        grid_spec=pltpu.PrefetchScalarGridSpec(
            num_scalar_prefetch=0,
            grid=(grid_m,),
            in_specs=[
                pl.BlockSpec((tm, _LANES), lambda i: (i, 0)),
                pl.BlockSpec((tm, _LANES), lambda i: (i, 0)),
            ],
            out_specs=pl.BlockSpec((1, _LANES), lambda i: (i, 0)),
        ),
        compiler_params=pltpu.CompilerParams(
            dimension_semantics=("parallel",),
            vmem_limit_bytes=_VMEM_LIMIT_BYTES,
        ),
    )(o, t)

    # Tiny final reduction + mean (over the ORIGINAL element count).
    return jnp.sum(psums) / float(total)


class QuantileLoss:
    """JAX/Pallas equivalent of the PyTorch QuantileLoss module (forward pass)."""

    def __init__(self, q_idx):
        self.q = float(QUANTILES[q_idx])
        self._fn = jax.jit(functools.partial(_quantile_loss_impl, q=self.q))

    def __call__(self, outputs, targets):
        return self._fn(outputs, targets)


def _reference(outputs, targets, q):
    e = targets.astype(jnp.float32) - outputs.astype(jnp.float32)
    return jnp.mean(jnp.maximum(q * e, (q - 1.0) * e))


if __name__ == "__main__":
    key = jax.random.PRNGKey(0)
    k1, k2, k3, k4 = jax.random.split(key, 4)

    # Small forecasting-style shape: (batch, horizon). 17*24 = 408 is NOT a
    # multiple of 128, exercising the lane-pad path + full-extent single block.
    batch, horizon = 17, 24
    outputs = jax.random.normal(k1, (batch, horizon), dtype=jnp.float32)
    targets = jax.random.normal(k2, (batch, horizon), dtype=jnp.float32)

    q_idx = 2  # q = 0.9
    loss = QuantileLoss(q_idx)(outputs, targets)
    jax.block_until_ready(loss)
    ref = _reference(outputs, targets, QUANTILES[q_idx])
    assert jnp.allclose(loss, ref, rtol=1e-5, atol=1e-5), (loss, ref)

    # Multi-block, lane-aligned, ragged-row case: 4100 rows -> even 2-way grid
    # (v7x megacore split), last block partially out-of-bounds -> exercises the
    # in-kernel row mask, with zero host-side padding/copies.
    outputs2 = jax.random.normal(k3, (4100, 128), dtype=jnp.float32)
    targets2 = jax.random.normal(k4, (4100, 128), dtype=jnp.float32)
    loss2 = QuantileLoss(0)(outputs2, targets2)
    jax.block_until_ready(loss2)
    ref2 = _reference(outputs2, targets2, QUANTILES[0])
    assert jnp.allclose(loss2, ref2, rtol=1e-5, atol=1e-5), (loss2, ref2)

    # bf16 path (halved HBM bytes); tile rows rounded to a multiple of 16.
    outputs3 = outputs2.astype(jnp.bfloat16)
    targets3 = targets2.astype(jnp.bfloat16)
    loss3 = QuantileLoss(1)(outputs3, targets3)
    jax.block_until_ready(loss3)
    ref3 = _reference(outputs3, targets3, QUANTILES[1])
    assert jnp.allclose(loss3, ref3, rtol=1e-3, atol=1e-3), (loss3, ref3)

    print("KERNEL_OK")
</pallas_src>

<mosaic_0001>
module attributes {stable_mosaic.version = 11 : i64} {
  func.func @_quantile_loss_kernel(%arg0: i32, %arg1: memref<4x128xf32, #tpu.memory_space<vmem>>, %arg2: memref<4x128xf32, #tpu.memory_space<vmem>>, %arg3: memref<1x128xf32, #tpu.memory_space<vmem>>) attributes {dimension_semantics = [#tpu.dimension_semantics<parallel>], iteration_bounds = array<i64: 1>, scalar_prefetch = 0 : i64, scratch_operands = 0 : i64, tpu.core_type = #tpu.core_type<tc>, window_params = [{transform_indices = @transform_0, window_bounds = array<i64: 4, 128>}, {transform_indices = @transform_1, window_bounds = array<i64: 4, 128>}, {transform_indices = @transform_2, window_bounds = array<i64: 1, 128>}]} {
    %c0 = arith.constant 0 : index
    %c0_0 = arith.constant 0 : index
    %0 = vector.load %arg1[%c0, %c0_0] : memref<4x128xf32, #tpu.memory_space<vmem>>, vector<4x128xf32>
    %c0_1 = arith.constant 0 : index
    %c0_2 = arith.constant 0 : index
    %1 = vector.load %arg2[%c0_1, %c0_2] : memref<4x128xf32, #tpu.memory_space<vmem>>, vector<4x128xf32>
    %2 = arith.subf %1, %0 : vector<4x128xf32>
    %cst = arith.constant 0.899999976 : f32
    %3 = vector.broadcast %cst : f32 to vector<4x128xf32>
    %4 = arith.mulf %3, %2 : vector<4x128xf32>
    %cst_3 = arith.constant -1.000000e-01 : f32
    %5 = vector.broadcast %cst_3 : f32 to vector<4x128xf32>
    %6 = arith.mulf %5, %2 : vector<4x128xf32>
    %7 = arith.maximumf %4, %6 : vector<4x128xf32>
    %cst_4 = arith.constant dense<0.000000e+00> : vector<128xf32>
    %8 = vector.multi_reduction <add>, %7, %cst_4 [0] : vector<4x128xf32> to vector<128xf32>
    %9 = vector.shape_cast %8 : vector<128xf32> to vector<1x128xf32>
    %c0_5 = arith.constant 0 : index
    %c0_6 = arith.constant 0 : index
    %10 = vector.load %arg3[%c0_5, %c0_6] : memref<1x128xf32, #tpu.memory_space<vmem>>, vector<1x128xf32>
    tpu.vector_store %arg3[%c0_5, %c0_6], %9 {strides = array<i32>} : memref<1x128xf32, #tpu.memory_space<vmem>>, vector<1x128xf32>,
    return
  }
  func.func @transform_0(%arg0: i32) -> (i32, i32) {
    %c0_i32 = arith.constant 0 : i32
    %c0_i32_0 = arith.constant 0 : i32
    return %arg0, %c0_i32 : i32, i32
  }
  func.func @transform_1(%arg0: i32) -> (i32, i32) {
    %c0_i32 = arith.constant 0 : i32
    %c0_i32_0 = arith.constant 0 : i32
    return %arg0, %c0_i32 : i32, i32
  }
  func.func @transform_2(%arg0: i32) -> (i32, i32) {
    %c0_i32 = arith.constant 0 : i32
    %c0_i32_0 = arith.constant 0 : i32
    return %arg0, %c0_i32 : i32, i32
  }
}

</mosaic_0001>

<bundles_post_ra>
// kernel: _quantile_loss_impl.1
= control target key start
LH: loop header
LB: loop body
LE: loop exit
PB: predicated region body
PF: predicated region fallthrough
CT: control target
= control target key end

     0   :  { %vm17_vm0 = vcmask 1043456   ;;  %s54_s0 = inlined_call_operand.vmem [shape: f32[4,128], index: 0, kind: input, shape index: {}]   ;;  %s55_s1 = inlined_call_operand.vmem [shape: f32[4,128], index: 1, kind: input, shape index: {}]   ;;  %s56_s2 = inlined_call_operand.vmem [shape: f32[1,128], index: 2, kind: output, shape index: {}]  }
   0x1   :  { %v11_v0 = vld [vmem:[%s54_s0] sm:$0xf] }
   0x2   :  { %v12_v1 = vld [vmem:[%s55_s1] sm:$0xf] }
   0x3   :  { %v13_v2 = vsub.f32 %v12_v1, %v11_v0 }
   0x5   :  { %v14_v3 = vmul.f32 0.9, %v13_v2  ;;  %v15_v4 = vmul.f32 -0.1, %v13_v2 }
   0x7   :  { %v16_v5 = vmax.f32 %v14_v3, %v15_v4 }
   0x9   :  { %v18_v6 = vsel %vm17_vm0, %v16_v5, 0.0 }
   0xa   :  { %v19_v7 = vrot.slane %v18_v6, 4 }
   0xc   :  { %v20_v8 = vadd.f32 %v19_v7, %v18_v6 }
   0xe   :  { %v21_v9 = vrot.slane %v20_v8, 2 }
  0x10   :  { %v22_v10 = vadd.f32 %v21_v9, %v20_v8 }
  0x12   :  { %v23_v11 = vrot.slane %v22_v10, 1 }
  0x14   :  { %v24_v12 = vadd.f32 %v23_v11, %v22_v10 }
  0x16   :  { %25 = vst [vmem:[%s56_s2] sm:$0x1] %v24_v12 }

</bundles_post_ra>
